<compile_context>
chip_gen: v7x
topology: tpu7x:2x2x1
jax: 0.10.0
libtpu: 0.0.40
codegen_flags: <defaults>
</compile_context>

<pallas_src>
import functools

import jax
import jax.numpy as jnp
from jax.experimental import pallas as pl
from jax.experimental.pallas import tpu as pltpu


def se_block_kernel(x_ref, wd_ref, wu_ref, bd_ref, bu_ref, o_ref, scale_ref,
                    *, bt, C, inv_hw):
    # x_ref: (rows, HW_pad) where rows = bt * C (whole images per block).
    x = x_ref[...]

    # Global average pool per (image, channel) row; accumulate in f32.
    xf = x if x.dtype == jnp.float32 else x.astype(jnp.float32)
    pooled = jnp.sum(xf, axis=1, keepdims=True) * inv_hw          # (rows, 1) f32

    wd = wd_ref[...]                                              # (C_int, C)
    wu = wu_ref[...]                                              # (C, C_int)
    bd = bd_ref[...]                                              # (C_int, 1)
    bu = bu_ref[...]                                              # (C, 1)

    # Excite path per image (constant-size weights, tiny matmuls, hidden under DMA).
    for b in range(bt):
        p_b = pooled[b * C:(b + 1) * C, :]                        # (C, 1)
        h_b = jnp.dot(wd, p_b, preferred_element_type=jnp.float32) + bd
        h_b = jnp.maximum(h_b, 0.0)                               # (C_int, 1)
        s_b = jnp.dot(wu, h_b, preferred_element_type=jnp.float32) + bu
        scale_ref[b * C:(b + 1) * C, :] = jax.nn.sigmoid(s_b)     # (C, 1)

    # Channel-wise scale broadcast along the lane (spatial) axis.
    # Multiply in the input dtype: single dense store, no f32 round-trip of x.
    o_ref[...] = x * scale_ref[...].astype(x.dtype)


def _vmem_plan():
    """(vmem_limit_bytes, tile_budget_bytes), derived from the chip generation."""
    try:
        cap = pltpu.get_tpu_info().vmem_capacity_bytes
    except Exception:
        cap = 64 * 1024 * 1024  # conservative (v7x-like) default
    if cap >= 96 * 1024 * 1024:          # v5e / v6e: 128 MiB physical VMEM
        return 100 * 1024 * 1024, 56 * 1024 * 1024
    # v7x: 64 MiB per TensorCore
    return 52 * 1024 * 1024, 28 * 1024 * 1024


def _choose_batch_tile(B, C, HW_pad, itemsize, budget_bytes, params_bytes):
    """Largest legal batch tile whose double-buffered in+out x tiles (plus the tiny
    params and f32 temporaries) fit the budget; prefers >= 2 grid steps (v7x)."""
    mult = max(8, 32 // itemsize)        # sublane multiple: 8 f32 / 16 bf16 / 32 int8
    cands = []
    for bt in range(1, B + 1):
        if B % bt:
            continue
        rows = bt * C
        if rows % mult != 0 and bt != B:
            continue                     # block sublane dim must be mult-of-8 or full
        foot = 4 * rows * HW_pad * itemsize + 2 * params_bytes + 8 * rows
        if foot > budget_bytes:
            continue
        cands.append(bt)

    if not cands:
        # TODO(synk): add an HW-tiled two-pass variant for images whose (C, HW) tile
        # exceeds VMEM; for now pick the smallest shape-legal tile.
        for bt in range(1, B + 1):
            if B % bt == 0 and ((bt * C) % mult == 0 or bt == B):
                return bt
        return B

    multi = [bt for bt in cands if B // bt >= 2]   # let ("parallel",) use both v7x TCs
    pool = multi if multi else cands
    capped = [bt for bt in pool if bt <= 64]       # bound the per-image unroll length
    pool = capped if capped else pool
    return max(pool)


def se_block(x, w_down, b_down, w_up, b_up):
    """x: (B, C, H, W). w_down: (C_int, C), w_up: (C, C_int). Matches PyTorch SEBlock."""
    B, C, H, W = x.shape
    C_int = w_down.shape[0]
    HW = H * W
    HW_pad = ((HW + 127) // 128) * 128            # lane-dense last dim

    x_flat = x.reshape(B * C, HW)
    if HW_pad != HW:
        x_flat = jnp.pad(x_flat, ((0, 0), (0, HW_pad - HW)))

    # Small parameters as separate (tiny, always-resident) inputs — no packed slab.
    wd = w_down.astype(jnp.float32)               # (C_int, C)
    wu = w_up.astype(jnp.float32)                 # (C, C_int)
    bd = b_down.astype(jnp.float32).reshape(C_int, 1)
    bu = b_up.astype(jnp.float32).reshape(C, 1)
    params_bytes = 4 * (C_int * C + C * C_int + C_int + C)

    vmem_limit, tile_budget = _vmem_plan()
    bt = _choose_batch_tile(B, C, HW_pad, x.dtype.itemsize, tile_budget, params_bytes)
    rows = bt * C
    grid = (B // bt,)

    kernel = functools.partial(se_block_kernel, bt=bt, C=C, inv_hw=float(1.0 / HW))

    out_flat = pl.pallas_call(
        kernel,
        out_shape=jax.ShapeDtypeStruct((B * C, HW_pad), x.dtype),
        grid=grid,
        in_specs=[
            pl.BlockSpec((rows, HW_pad), lambda i: (i, 0)),   # x rows (dense sublanes)
            pl.BlockSpec(wd.shape, lambda i: (0, 0)),         # down weights
            pl.BlockSpec(wu.shape, lambda i: (0, 0)),         # up weights
            pl.BlockSpec(bd.shape, lambda i: (0, 0)),         # down bias (column)
            pl.BlockSpec(bu.shape, lambda i: (0, 0)),         # up bias (column)
        ],
        out_specs=pl.BlockSpec((rows, HW_pad), lambda i: (i, 0)),
        scratch_shapes=[pltpu.VMEM((rows, 1), jnp.float32)],  # per-row channel scale
        compiler_params=pltpu.CompilerParams(
            dimension_semantics=("parallel",),
            vmem_limit_bytes=vmem_limit,
        ),
    )(x_flat, wd, wu, bd, bu)

    if HW_pad != HW:
        out_flat = out_flat[:, :HW]
    return out_flat.reshape(B, C, H, W)


def se_block_ref(x, w_down, b_down, w_up, b_up):
    # Pure-JAX reference matching the PyTorch forward.
    pooled = jnp.mean(x, axis=(2, 3))                     # (B, C)
    h = jnp.maximum(pooled @ w_down.T + b_down, 0.0)      # (B, C_int)
    s = jax.nn.sigmoid(h @ w_up.T + b_up)                 # (B, C)
    return x * s[:, :, None, None]


if __name__ == "__main__":
    B, C, H, W = 2, 4, 16, 16          # input_channels=4
    C_int = 8                           # internal_neurons=8

    key = jax.random.PRNGKey(0)
    k_x, k_wd, k_bd, k_wu, k_bu = jax.random.split(key, 5)
    x = jax.random.normal(k_x, (B, C, H, W), dtype=jnp.float32)
    w_down = jax.random.normal(k_wd, (C_int, C), dtype=jnp.float32) * 0.1
    b_down = jax.random.normal(k_bd, (C_int,), dtype=jnp.float32) * 0.1
    w_up = jax.random.normal(k_wu, (C, C_int), dtype=jnp.float32) * 0.1
    b_up = jax.random.normal(k_bu, (C,), dtype=jnp.float32) * 0.1

    out = se_block(x, w_down, b_down, w_up, b_up)
    out = jax.block_until_ready(out)

    ref = se_block_ref(x, w_down, b_down, w_up, b_up)
    assert out.shape == (B, C, H, W)
    assert jnp.allclose(out, ref, atol=1e-5, rtol=1e-5)
    print("KERNEL_OK")
</pallas_src>

<mosaic_0001>
module attributes {stable_mosaic.version = 11 : i64} {
  func.func @se_block_kernel(%arg0: i32, %arg1: memref<8x256xf32, #tpu.memory_space<vmem>>, %arg2: memref<8x4xf32, #tpu.memory_space<vmem>>, %arg3: memref<4x8xf32, #tpu.memory_space<vmem>>, %arg4: memref<8x1xf32, #tpu.memory_space<vmem>>, %arg5: memref<4x1xf32, #tpu.memory_space<vmem>>, %arg6: memref<8x256xf32, #tpu.memory_space<vmem>>, %arg7: memref<8x1xf32, #tpu.memory_space<vmem>>) attributes {dimension_semantics = [#tpu.dimension_semantics<parallel>], iteration_bounds = array<i64: 1>, scalar_prefetch = 0 : i64, scratch_operands = 1 : i64, tpu.core_type = #tpu.core_type<tc>, window_params = [{transform_indices = @transform_0, window_bounds = array<i64: 8, 256>}, {pipeline_mode = #tpu.pipeline_mode<synchronous>, transform_indices = @transform_1, window_bounds = array<i64: 8, 4>}, {pipeline_mode = #tpu.pipeline_mode<synchronous>, transform_indices = @transform_2, window_bounds = array<i64: 4, 8>}, {pipeline_mode = #tpu.pipeline_mode<synchronous>, transform_indices = @transform_3, window_bounds = array<i64: 8, 1>}, {pipeline_mode = #tpu.pipeline_mode<synchronous>, transform_indices = @transform_4, window_bounds = array<i64: 4, 1>}, {transform_indices = @transform_5, window_bounds = array<i64: 8, 256>}]} {
    %c0 = arith.constant 0 : index
    %c0_0 = arith.constant 0 : index
    %0 = vector.load %arg1[%c0, %c0_0] : memref<8x256xf32, #tpu.memory_space<vmem>>, vector<8x256xf32>
    %cst = arith.constant dense<0.000000e+00> : vector<8xf32>
    %1 = vector.multi_reduction <add>, %0, %cst [1] : vector<8x256xf32> to vector<8xf32>
    %2 = vector.shape_cast %1 : vector<8xf32> to vector<8x1xf32>
    %cst_1 = arith.constant 3.906250e-03 : f32
    %3 = vector.broadcast %cst_1 : f32 to vector<8x1xf32>
    %4 = arith.mulf %2, %3 : vector<8x1xf32>
    %c0_2 = arith.constant 0 : index
    %c0_3 = arith.constant 0 : index
    %5 = vector.load %arg2[%c0_2, %c0_3] : memref<8x4xf32, #tpu.memory_space<vmem>>, vector<8x4xf32>
    %c0_4 = arith.constant 0 : index
    %c0_5 = arith.constant 0 : index
    %6 = vector.load %arg3[%c0_4, %c0_5] : memref<4x8xf32, #tpu.memory_space<vmem>>, vector<4x8xf32>
    %c0_6 = arith.constant 0 : index
    %c0_7 = arith.constant 0 : index
    %7 = vector.load %arg4[%c0_6, %c0_7] : memref<8x1xf32, #tpu.memory_space<vmem>>, vector<8x1xf32>
    %c0_8 = arith.constant 0 : index
    %c0_9 = arith.constant 0 : index
    %8 = vector.load %arg5[%c0_8, %c0_9] : memref<4x1xf32, #tpu.memory_space<vmem>>, vector<4x1xf32>
    %9 = vector.extract_strided_slice %4 {offsets = [0, 0], sizes = [4, 1], strides = [1, 1]} : vector<8x1xf32> to vector<4x1xf32>
    %cst_10 = arith.constant dense<0.000000e+00> : vector<8x1xf32>
    %10 = tpu.matmul %5, %9, %cst_10 {dimension_numbers = #tpu.dot_dimension_numbers<[1], [0], [0], [1], [0, 0, 1, 1], [], []>} : vector<8x4xf32>, vector<4x1xf32>, vector<8x1xf32> -> vector<8x1xf32>
    %11 = arith.addf %10, %7 : vector<8x1xf32>
    %cst_11 = arith.constant 0.000000e+00 : f32
    %12 = vector.broadcast %cst_11 : f32 to vector<8x1xf32>
    %13 = arith.maximumf %11, %12 : vector<8x1xf32>
    %cst_12 = arith.constant dense<0.000000e+00> : vector<4x1xf32>
    %14 = tpu.matmul %6, %13, %cst_12 {dimension_numbers = #tpu.dot_dimension_numbers<[1], [0], [0], [1], [0, 0, 1, 1], [], []>} : vector<4x8xf32>, vector<8x1xf32>, vector<4x1xf32> -> vector<4x1xf32>
    %15 = arith.addf %14, %8 : vector<4x1xf32>
    %16 = arith.negf %15 : vector<4x1xf32>
    %17 = math.exp %16 : vector<4x1xf32>
    %cst_13 = arith.constant 1.000000e+00 : f32
    %18 = vector.broadcast %cst_13 : f32 to vector<4x1xf32>
    %19 = arith.addf %18, %17 : vector<4x1xf32>
    %20 = arith.divf %18, %19 : vector<4x1xf32>
    %c0_14 = arith.constant 0 : index
    %c0_15 = arith.constant 0 : index
    %21 = vector.load %arg7[%c0_14, %c0_15] : memref<8x1xf32, #tpu.memory_space<vmem>>, vector<4x1xf32>
    tpu.vector_store %arg7[%c0_14, %c0_15], %20 {strides = array<i32>} : memref<8x1xf32, #tpu.memory_space<vmem>>, vector<4x1xf32>,
    %22 = vector.extract_strided_slice %4 {offsets = [4, 0], sizes = [4, 1], strides = [1, 1]} : vector<8x1xf32> to vector<4x1xf32>
    %cst_16 = arith.constant dense<0.000000e+00> : vector<8x1xf32>
    %23 = tpu.matmul %5, %22, %cst_16 {dimension_numbers = #tpu.dot_dimension_numbers<[1], [0], [0], [1], [0, 0, 1, 1], [], []>} : vector<8x4xf32>, vector<4x1xf32>, vector<8x1xf32> -> vector<8x1xf32>
    %24 = arith.addf %23, %7 : vector<8x1xf32>
    %cst_17 = arith.constant 0.000000e+00 : f32
    %25 = vector.broadcast %cst_17 : f32 to vector<8x1xf32>
    %26 = arith.maximumf %24, %25 : vector<8x1xf32>
    %cst_18 = arith.constant dense<0.000000e+00> : vector<4x1xf32>
    %27 = tpu.matmul %6, %26, %cst_18 {dimension_numbers = #tpu.dot_dimension_numbers<[1], [0], [0], [1], [0, 0, 1, 1], [], []>} : vector<4x8xf32>, vector<8x1xf32>, vector<4x1xf32> -> vector<4x1xf32>
    %28 = arith.addf %27, %8 : vector<4x1xf32>
    %29 = arith.negf %28 : vector<4x1xf32>
    %30 = math.exp %29 : vector<4x1xf32>
    %cst_19 = arith.constant 1.000000e+00 : f32
    %31 = vector.broadcast %cst_19 : f32 to vector<4x1xf32>
    %32 = arith.addf %31, %30 : vector<4x1xf32>
    %33 = arith.divf %31, %32 : vector<4x1xf32>
    %c4 = arith.constant 4 : index
    %c0_20 = arith.constant 0 : index
    %34 = vector.load %arg7[%c4, %c0_20] : memref<8x1xf32, #tpu.memory_space<vmem>>, vector<4x1xf32>
    tpu.vector_store %arg7[%c4, %c0_20], %33 {strides = array<i32>} : memref<8x1xf32, #tpu.memory_space<vmem>>, vector<4x1xf32>,
    %c0_21 = arith.constant 0 : index
    %c0_22 = arith.constant 0 : index
    %35 = vector.load %arg7[%c0_21, %c0_22] : memref<8x1xf32, #tpu.memory_space<vmem>>, vector<8x1xf32>
    %36 = vector.broadcast %35 : vector<8x1xf32> to vector<8x256xf32>
    %37 = arith.mulf %0, %36 : vector<8x256xf32>
    %c0_23 = arith.constant 0 : index
    %c0_24 = arith.constant 0 : index
    %38 = vector.load %arg6[%c0_23, %c0_24] : memref<8x256xf32, #tpu.memory_space<vmem>>, vector<8x256xf32>
    tpu.vector_store %arg6[%c0_23, %c0_24], %37 {strides = array<i32>} : memref<8x256xf32, #tpu.memory_space<vmem>>, vector<8x256xf32>,
    return
  }
  func.func @transform_0(%arg0: i32) -> (i32, i32) {
    %c0_i32 = arith.constant 0 : i32
    %c0_i32_0 = arith.constant 0 : i32
    return %arg0, %c0_i32 : i32, i32
  }
  func.func @transform_1(%arg0: i32) -> (i32, i32) {
    %c0_i32 = arith.constant 0 : i32
    %c0_i32_0 = arith.constant 0 : i32
    %c0_i32_1 = arith.constant 0 : i32
    return %c0_i32, %c0_i32_0 : i32, i32
  }
  func.func @transform_2(%arg0: i32) -> (i32, i32) {
    %c0_i32 = arith.constant 0 : i32
    %c0_i32_0 = arith.constant 0 : i32
    %c0_i32_1 = arith.constant 0 : i32
    return %c0_i32, %c0_i32_0 : i32, i32
  }
  func.func @transform_3(%arg0: i32) -> (i32, i32) {
    %c0_i32 = arith.constant 0 : i32
    %c0_i32_0 = arith.constant 0 : i32
    %c0_i32_1 = arith.constant 0 : i32
    return %c0_i32, %c0_i32_0 : i32, i32
  }
  func.func @transform_4(%arg0: i32) -> (i32, i32) {
    %c0_i32 = arith.constant 0 : i32
    %c0_i32_0 = arith.constant 0 : i32
    %c0_i32_1 = arith.constant 0 : i32
    return %c0_i32, %c0_i32_0 : i32, i32
  }
  func.func @transform_5(%arg0: i32) -> (i32, i32) {
    %c0_i32 = arith.constant 0 : i32
    %c0_i32_0 = arith.constant 0 : i32
    return %arg0, %c0_i32 : i32, i32
  }
}

</mosaic_0001>

<bundles_post_ra>
// kernel: tpu_custom_call.1
= control target key start
LH: loop header
LB: loop body
LE: loop exit
PB: predicated region body
PF: predicated region fallthrough
CT: control target
= control target key end

     0   :  { %s516_s0 = inlined_call_operand.vmem [shape: f32[8,256], index: 0, kind: input, shape index: {}]   ;;  %s517_s1 = inlined_call_operand.vmem [shape: f32[8,4], index: 1, kind: input, shape index: {}]   ;;  %s518_s2 = inlined_call_operand.vmem [shape: f32[4,8], index: 2, kind: input, shape index: {}]   ;;  %s519_s3 = inlined_call_operand.vmem [shape: f32[8,1], index: 3, kind: input, shape index: {}]   ;;  %s520_s4 = inlined_call_operand.vmem [shape: f32[4,1], index: 4, kind: input, shape index: {}]   ;;  %s521_s5 = inlined_call_operand.hbm [shape: f32[8,256], index: 5, kind: output, shape index: {}]  }
   0x1   :  { %v477_v0 = vld [vmem:[%s516_s0] sm:$0xff]  ;;  %v482_v1 = vld [vmem:[%s516_s0 + $0x8] sm:$0xff] }
   0x2   :  { %10 = vsyncpa [#allocation4], 0  ;;  %v23_v2 = vadd.f32 %v482_v1, %v477_v0  ;;  %v440_v3 = vmov 0.0   ;;  %vm441_vm0 = vmmov 0   ;;  %vm35_vm1 = vcmask 1043456   ;;  %v27_v6 = vld [vmem:[%s517_s1] sm:$0xff] }
   0x3   :  { %383 = vmatprep.subr.mxu0 %v440_v3  ;;  %388 = vmatprep.subr.mxu1 %v440_v3  ;;  %vm31_vm2 = vcmask 31744   ;;  %v29_v8 = vld [vmem:[%s519_s3] sm:$0xff]  ;;  %vm110_vm3 = vcmask 64512   ;;  %v442_v18 = vmov 0   ;;  %vm190_vm4 = vcmask 3072  }
   0x4   :  { %24 = vadd.xlane.f32.xlu0 %v23_v2  ;;  %385 = vmatprep.mubr.msk.f32.mxu0 %vm441_vm0, %v440_v3  ;;  %v28_v13 = vld [vmem:[%s518_s2] sm:$0xf]  ;;  %s443_s2 = smov [#allocation3]  }
   0x5   :  { %390 = vmatprep.mubr.msk.f32.mxu1 %vm441_vm0, %v440_v3  ;;  %407 = vset.pattern.permute.xlu0 %v442_v18  ;;  %v30_v19 = vld [vmem:[%s520_s4] sm:$0xf]  ;;  %s359_s4 = sshll.u32 %s443_s2, 4  ;;  %s360_s4 = int_to_ptr.vmem [resolvable:$true] %s359_s4 }
   0x6   :  { %s416_s27 = scalar_lea.vmem %s360_s4, 256  ;;  %p421_p1 = scmp.lt.s32.totalorder %s360_s4, %s360_s4 }
   0x7   :  { %p417_p0 = scmp.ne.s32.totalorder %s360_s4, %s416_s27  ;;  %p422_p2 = scmp.lt.s32.totalorder %s416_s27, %s416_s27 }
   0x9   :  { %p423_p3 = por %p422_p2, %p421_p1 }
   0xb   :  { %p424_p4 = pnand %p423_p3, %p417_p0 }
  0x91   :  { %v25_v4 = vpop.xlane.xlu0 %24 }
  0x92   :  { %v26_v5 = vmul.f32 0.00390625, %v25_v4 }
  0x94   :  { %v192_v7 = vrot.slane %v26_v5, 4  ;;  %384 = vmatpush3.msk.msra.mxu0 %vm35_vm1, %v26_v5 }
  0x95   :  { %386 = vmatmul.mubr.msk.f32.vlgmr.msra.gmra.mrb[0].mxu0 %vm31_vm2, %v27_v6  ;;  %393 = vmatprep.subr.mxu0 %v440_v3 }
  0x96   :  { %394 = vmatpush3.msk.msra.mxu0 %vm35_vm1, %v192_v7  ;;  %395 = vmatprep.mubr.msk.f32.mxu0 %vm441_vm0, %v440_v3 }
  0x99   :  { %396 = vmatmul.mubr.msk.f32.vlgmr.msra.gmra.mrb[2].mxu0 %vm31_vm2, %v27_v6 }
 0x168   :  { %v105_v9 = vpop.f32.mrb[0].mxu0 }
 0x169   :  { %v106_v10 = vadd.f32 %v105_v9, %v29_v8  ;;  %v387_v11 = vpop.f32.mrb[1].mxu0 }
 0x16b   :  { %v109_v12 = vmax.f32 %v106_v10, 0.0 }
 0x16c   :  { %v261_v14 = vpop.f32.mrb[2].mxu0 }
 0x16d   :  { %v262_v15 = vadd.f32 %v261_v14, %v29_v8  ;;  %389 = vmatpush3.msra.mxu1 %v109_v12  ;;  %v397_v16 = vpop.f32.mrb[3].mxu0 }
 0x16e   :  { %391 = vmatmul.mubr.msk.f32.vlgmr.msra.gmra.mrb[0].mxu1 %vm110_vm3, %v28_v13  ;;  %398 = vmatprep.subr.mxu1 %v440_v3 }
 0x16f   :  { %v265_v17 = vmax.f32 %v262_v15, 0.0  ;;  %400 = vmatprep.mubr.msk.f32.mxu1 %vm441_vm0, %v440_v3 }
 0x171   :  { %399 = vmatpush3.msra.mxu1 %v265_v17 }
 0x172   :  { %401 = vmatmul.mubr.msk.f32.vlgmr.msra.gmra.mrb[2].mxu1 %vm110_vm3, %v28_v13 }
 0x241   :  { %v180_v20 = vpop.f32.mrb[0].mxu1 }
 0x242   :  { %v181_v21 = vadd.f32 %v180_v20, %v30_v19  ;;  %v392_v22 = vpop.f32.mrb[1].mxu1 }
 0x244   :  { %v370_v23 = vmul.f32 -1.442695, %v181_v21 }
 0x245   :  { %v332_v24 = vpop.f32.mrb[2].mxu1 }
 0x246   :  { %408 = vpow2.f32 %v370_v23  ;;  %v333_v25 = vadd.f32 %v332_v24, %v30_v19  ;;  %v402_v26 = vpop.f32.mrb[3].mxu1 }
 0x248   :  { %v374_v27 = vmul.f32 -1.442695, %v333_v25 }
 0x24a   :  { %410 = vpow2.f32 %v374_v27 }
 0x250   :  { %v409_v28 = vpop.eup %408 }
 0x251   :  { %v187_v29 = vadd.f32 1.0, %v409_v28 }
 0x253   :  { %412 = vrcp.f32 %v187_v29 }
 0x254   :  { %v411_v30 = vpop.eup %410 }
 0x255   :  { %v339_v31 = vadd.f32 1.0, %v411_v30 }
 0x257   :  { %414 = vrcp.f32 %v339_v31 }
 0x25d   :  { %v413_v32 = vpop.eup %412 }
 0x25e   :  { %191 = vst.msk [vmem:[#allocation2] sm:$0xf] %vm190_vm4, %v413_v32 }
 0x261   :  { %v415_v33 = vpop.eup %414 }
 0x262   :  { %342 = vst.msk [vmem:[#allocation2 + $0x4] sm:$0xf] %vm190_vm4, %v415_v33 }
 0x269   :  { %v343_v34 = vld [vmem:[#allocation2] sm:$0xff] }
 0x26a   :  { %346 = vperm.xlu0 %407, %v343_v34  }
 0x2e9   :  { %v347_v35 = vpop.permute.xlu0 %346 }
 0x2ea   :  { %v349_v36 = vmul.f32 %v347_v35, %v477_v0  ;;  %v350_v37 = vmul.f32 %v347_v35, %v482_v1 }
 0x2ec   :  { %351 = vst [vmem:[#allocation3] sm:$0xff] %v349_v36  ;;  %352 = vst [vmem:[#allocation3 + $0x8] sm:$0xff] %v350_v37 }
 0x2ed   :  { %427 = shalt.err (!%p424_p4)
}
 0x2ee   :  { %s428_s30 = scalar_lea.hbm %s521_s5, 256 }
 0x2ef   :  { %p429_p5 = scmp.ne.s32.totalorder %s521_s5, %s428_s30  ;;  %p432_p6 = scmp.lt.u32.totalorder %s428_s30, %s521_s5 }
 0x2f1   :  { %p434_p7 = pnand %p432_p6, %p429_p5 }
 0x2f3   :  { %437 = shalt.err (!%p434_p7)
}
 0x2f4   :  { %362 = dma.vmem_to_hbm [thread:$0]  %s360_s4, 256, %s521_s5, [#allocation4]  }
 0x2f5   :  { %438 = dma.done.wait [#allocation4], 256  }
 0x2f6   :  { %439 = vsyncadd [#allocation4], 4294967040 }
 0x2f7   :  { %366 = vsyncpa [#allocation4], 1 }

</bundles_post_ra>
